<compile_context>
chip_gen: v5e
topology: v5e:2x2
jax: 0.10.0
libtpu: 0.0.40
codegen_flags: <defaults>
</compile_context>

<pallas_src>
import jax
import jax.numpy as jnp
from jax.experimental import pallas as pl
from jax.experimental.pallas import tpu as pltpu


def _plan_chunks(leading, total_bytes, max_chunks=4, min_chunk_bytes=1 << 20):
    """Static (start, rows) splits of the leading dim for 1-4 outstanding DMAs."""
    if leading <= 1 or total_bytes < 2 * min_chunk_bytes:
        return ((0, leading),)
    n = min(max_chunks, leading, total_bytes // min_chunk_bytes)
    base, rem = divmod(leading, n)
    chunks, start = [], 0
    for i in range(n):
        rows = base + (1 if i < rem else 0)
        chunks.append((start, rows))
        start += rows
    return tuple(chunks)


def _make_dma_copy_kernel(chunks, full_rows):
    """HBM->HBM copy kernel: start all chunk DMAs, then wait on all of them."""
    single_full = len(chunks) == 1 and chunks[0] == (0, full_rows)

    def kernel(x_hbm, o_hbm, sem):
        if single_full:
            cp = pltpu.make_async_copy(x_hbm, o_hbm, sem.at[0])
            cp.start()
            cp.wait()
            return
        descs = []
        for i, (start, rows) in enumerate(chunks):
            d = pltpu.make_async_copy(
                x_hbm.at[pl.ds(start, rows)],
                o_hbm.at[pl.ds(start, rows)],
                sem.at[i],
            )
            d.start()
            descs.append(d)
        for d in descs:
            d.wait()

    return kernel


@jax.jit
def _identity_forward(x: jax.Array) -> jax.Array:
    """Identity pass-through as a direct HBM->HBM DMA (no VMEM staging)."""
    squeeze_back = False
    if x.ndim == 0:
        x = x.reshape(1)
        squeeze_back = True

    leading = x.shape[0]
    total_bytes = x.size * jnp.dtype(x.dtype).itemsize
    chunks = _plan_chunks(leading, total_bytes)

    out = pl.pallas_call(
        _make_dma_copy_kernel(chunks, leading),
        out_shape=jax.ShapeDtypeStruct(x.shape, x.dtype),
        in_specs=[pl.BlockSpec(memory_space=pl.ANY)],
        out_specs=pl.BlockSpec(memory_space=pl.ANY),
        scratch_shapes=[pltpu.SemaphoreType.DMA((len(chunks),))],
    )(x)

    if squeeze_back:
        out = out.reshape(())
    return out


class BaseVAEPallas:
    """JAX/Pallas counterpart of models.vae._Base (abstract base: identity)."""

    def __init__(self, dim_latent: int = 100, min_copy_bytes: int = 256 * 1024):
        self.dim_latent = dim_latent        # stored only; the base class has no params
        self.min_copy_bytes = min_copy_bytes

    def __call__(self, x: jax.Array) -> jax.Array:
        if x.size == 0:
            return x
        nbytes = x.size * jnp.dtype(x.dtype).itemsize
        if nbytes < self.min_copy_bytes:
            # Fast path: identity needs zero HBM traffic; for tiny tensors the
            # fixed pallas_call + DMA overhead dwarfs the copy itself.
            return x
        return _identity_forward(x)


if __name__ == "__main__":
    key = jax.random.PRNGKey(0)
    model = BaseVAEPallas(dim_latent=100)                           # default fast path < 256 KiB
    model_kernel = BaseVAEPallas(dim_latent=100, min_copy_bytes=0)  # always run the DMA kernel

    # Primary check: small NCHW input consistent with a VAE image input,
    # forced through the Pallas HBM->HBM DMA kernel.
    x = jax.random.normal(key, (2, 4, 16, 16), dtype=jnp.float32)
    y = model_kernel(x)
    jax.block_until_ready(y)
    assert y.shape == x.shape and y.dtype == x.dtype
    assert bool(jnp.array_equal(y, x)), "identity pass-through mismatch (f32)"

    # Odd / non-128-aligned shape: the direct DMA has no layout constraints.
    x_odd = jax.random.normal(jax.random.PRNGKey(1), (2, 3, 5, 7), dtype=jnp.float32)
    y_odd = model_kernel(x_odd)
    jax.block_until_ready(y_odd)
    assert y_odd.shape == x_odd.shape
    assert bool(jnp.array_equal(y_odd, x_odd)), "identity pass-through mismatch (odd)"

    # bf16: dtype-agnostic copy (no sublane-packing concerns for a raw DMA).
    x_bf16 = jax.random.normal(jax.random.PRNGKey(2), (2, 4, 16, 16)).astype(jnp.bfloat16)
    y_bf16 = model_kernel(x_bf16)
    jax.block_until_ready(y_bf16)
    assert bool(jnp.array_equal(y_bf16, x_bf16)), "identity pass-through mismatch (bf16)"

    # Larger input (4 MiB): exercises the multi-chunk (4 outstanding DMAs) path
    # and, with the default model, also goes through the kernel (>= 256 KiB).
    x_big = jax.random.normal(jax.random.PRNGKey(3), (16, 4, 128, 128), dtype=jnp.float32)
    y_big = model(x_big)
    jax.block_until_ready(y_big)
    assert bool(jnp.array_equal(y_big, x_big)), "identity pass-through mismatch (big)"

    # Tiny tensor via the default model: fast path returns the input untouched.
    x_small = jax.random.normal(jax.random.PRNGKey(4), (2, 100), dtype=jnp.float32)
    y_small = model(x_small)
    jax.block_until_ready(y_small)
    assert bool(jnp.array_equal(y_small, x_small)), "fast-path mismatch"

    print("KERNEL_OK")
</pallas_src>

<mosaic_0001>
module attributes {stable_mosaic.version = 11 : i64} {
  func.func @kernel(%arg0: memref<2x4x16x16xf32, #tpu.memory_space<any>>, %arg1: memref<2x4x16x16xf32, #tpu.memory_space<any>>, %arg2: memref<1x!tpu.dma_semaphore, #tpu.memory_space<semaphore_mem>>) attributes {dimension_semantics = [], scalar_prefetch = 0 : i64, scratch_operands = 1 : i64, tpu.core_type = #tpu.core_type<tc>} {
    %c0_i32 = arith.constant 0 : i32
    %0 = tpu.memref_slice %arg2[%c0_i32] : memref<1x!tpu.dma_semaphore, #tpu.memory_space<semaphore_mem>> -> memref<1x!tpu.dma_semaphore, #tpu.memory_space<semaphore_mem>>
    %1 = tpu.memref_squeeze %0 : memref<1x!tpu.dma_semaphore, #tpu.memory_space<semaphore_mem>> -> memref<!tpu.dma_semaphore, #tpu.memory_space<semaphore_mem>>
    tpu.enqueue_dma source(%arg0 : memref<2x4x16x16xf32, #tpu.memory_space<any>>) target(%arg1 : memref<2x4x16x16xf32, #tpu.memory_space<any>>) target_semaphore(%1 : memref<!tpu.dma_semaphore, #tpu.memory_space<semaphore_mem>>)
    %c0_i32_0 = arith.constant 0 : i32
    %2 = tpu.memref_slice %arg2[%c0_i32_0] : memref<1x!tpu.dma_semaphore, #tpu.memory_space<semaphore_mem>> -> memref<1x!tpu.dma_semaphore, #tpu.memory_space<semaphore_mem>>
    %3 = tpu.memref_squeeze %2 : memref<1x!tpu.dma_semaphore, #tpu.memory_space<semaphore_mem>> -> memref<!tpu.dma_semaphore, #tpu.memory_space<semaphore_mem>>
    tpu.wait_dma2 semaphore(%3 : memref<!tpu.dma_semaphore, #tpu.memory_space<semaphore_mem>>) src(%arg0 : memref<2x4x16x16xf32, #tpu.memory_space<any>>) dst(%arg1 : memref<2x4x16x16xf32, #tpu.memory_space<any>>)
    return
  }
}

</mosaic_0001>

<bundles_post_ra>
// kernel: _identity_forward.1
= control target key start
LH: loop header
LB: loop body
LE: loop exit
PB: predicated region body
PF: predicated region fallthrough
CT: control target
= control target key end

     0   :  { %s34_s12 = smov [#allocation2]   ;;  %s35_s13 = smov [#allocation3]   ;;  %s53_s0 = inlined_call_operand.hbm [shape: f32[2,4,16,16], index: 0, kind: input, shape index: {}]   ;;  %s54_s1 = inlined_call_operand.hbm [shape: f32[2,4,16,16], index: 1, kind: output, shape index: {}]  }
   0x1   :  { %s10_s8 = sshll.u32 %s53_s0, 4  ;;  %s12_s11 = sshll.u32 %s54_s1, 4  ;;  %s11_s8 = int_to_ptr.hbm [resolvable:$true] %s10_s8  ;;  %s13_s11 = int_to_ptr.hbm [resolvable:$true] %s12_s11 }
   0x2   :  { %s36_s14 = smov 0  }
   0x3   :  { %16 = dma.general %s11_s8, 2048, %s13_s11, %s34_s12, %s35_s13, [#allocation4], %s36_s14, 0  }
   0x4   :  { %32 = dma.done.wait [#allocation2], 2048 }
   0x5   :  { %33 = vsyncadd [#allocation2], 4294965248 }
   0x6   :  { %22 = vsyncmov [#allocation2] }
   0x9   :  { %s23_s15 = vpop.sfrf %22 }
   0xa   :  { %p28_p0 = scmp.ne.s32.totalorder %s23_s15, 0 }
   0xc   :  { %27 = shalt.err (%p28_p0)  }

</bundles_post_ra>
